<compile_context>
chip_gen: v7x
topology: tpu7x:2x2x1
jax: 0.10.0
libtpu: 0.0.40
codegen_flags: <defaults>
</compile_context>

<pallas_src>
import jax
import jax.numpy as jnp
from jax.experimental import pallas as pl
from jax.experimental.pallas import tpu as pltpu


def _round_up(x, m):
    return ((x + m - 1) // m) * m


# ---------------------------------------------------------------------------
# Kernel 1: single-layer GRU recurrence over time (PyTorch GRU equations).
# ---------------------------------------------------------------------------
def _gru_kernel(x_ref, w_ih_ref, w_hh_ref, b_ih_ref, b_hh_ref, h0_ref,
                out_ref, states_ref, h_scratch):
    t = pl.program_id(0)

    @pl.when(t == 0)
    def _():
        h_scratch[...] = h0_ref[...]

    x_t = x_ref[0].astype(jnp.bfloat16)     # [B, E] bf16 MXU operand
    h_prev = h_scratch[...]                 # [B, H] f32 carry
    h_b = h_prev.astype(jnp.bfloat16)

    def gates(i):
        gi = jnp.dot(x_t, w_ih_ref[i],
                     preferred_element_type=jnp.float32) + b_ih_ref[i]
        gh = jnp.dot(h_b, w_hh_ref[i],
                     preferred_element_type=jnp.float32) + b_hh_ref[i]
        return gi, gh

    gi_r, gh_r = gates(0)
    gi_z, gh_z = gates(1)
    gi_n, gh_n = gates(2)

    r = jax.nn.sigmoid(gi_r + gh_r)
    z = jax.nn.sigmoid(gi_z + gh_z)
    n = jnp.tanh(gi_n + r * gh_n)
    h_new = (1.0 - z) * n + z * h_prev

    h_scratch[...] = h_new
    out_ref[0] = h_new.astype(out_ref.dtype)
    states_ref[...] = h_new.astype(states_ref.dtype)


def gru_forward(x, h0, w_ih, w_hh, b_ih, b_hh):
    """x: [B,S,E] f32; h0: [B,H] f32; w_ih: [3,E,H]; w_hh: [3,H,H];
    b_ih/b_hh: [3,1,H] f32 -> (out [B,S,H] f32, h_final [B,H] f32)."""
    B, S, E = x.shape
    H = h0.shape[1]

    x_tm = jnp.transpose(x, (1, 0, 2))                # time-major [S, B, E]
    w_ih_b = w_ih.astype(jnp.bfloat16)
    w_hh_b = w_hh.astype(jnp.bfloat16)

    out_tm, h_final = pl.pallas_call(
        _gru_kernel,
        out_shape=(jax.ShapeDtypeStruct((S, B, H), jnp.float32),
                   jax.ShapeDtypeStruct((B, H), jnp.float32)),
        grid_spec=pltpu.PrefetchScalarGridSpec(
            num_scalar_prefetch=0,
            grid=(S,),
            in_specs=[
                pl.BlockSpec((1, B, E), lambda t: (t, 0, 0)),   # x_t slice
                pl.BlockSpec((3, E, H), lambda t: (0, 0, 0)),   # W_ih resident
                pl.BlockSpec((3, H, H), lambda t: (0, 0, 0)),   # W_hh resident
                pl.BlockSpec((3, 1, H), lambda t: (0, 0, 0)),   # b_ih resident
                pl.BlockSpec((3, 1, H), lambda t: (0, 0, 0)),   # b_hh resident
                pl.BlockSpec((B, H), lambda t: (0, 0)),         # h0 resident
            ],
            out_specs=(
                pl.BlockSpec((1, B, H), lambda t: (t, 0, 0)),   # out_t slice
                pl.BlockSpec((B, H), lambda t: (0, 0)),         # final state
            ),
            scratch_shapes=[pltpu.VMEM((B, H), jnp.float32)],
        ),
        compiler_params=pltpu.CompilerParams(
            dimension_semantics=("arbitrary",),       # sequential recurrence
            vmem_limit_bytes=32 * 1024 * 1024,
        ),
    )(x_tm, w_ih_b, w_hh_b, b_ih, b_hh, h0)

    return jnp.transpose(out_tm, (1, 0, 2)), h_final


# ---------------------------------------------------------------------------
# Kernel 2: classifier head (linear + softmax), row-tiled.
# ---------------------------------------------------------------------------
def _classifier_softmax_kernel(h_ref, w_ref, b_ref, o_ref):
    # h_ref: [TM, H] f32; w_ref: [H, V] bf16 (resident); b_ref: [1, V] f32.
    logits = jnp.dot(h_ref[...].astype(jnp.bfloat16), w_ref[...],
                     preferred_element_type=jnp.float32)
    logits = logits + b_ref[...]
    m = jnp.max(logits, axis=-1, keepdims=True)
    e = jnp.exp(logits - m)
    denom = jnp.sum(e, axis=-1, keepdims=True)
    o_ref[...] = (e * pl.reciprocal(denom, approx=True)).astype(o_ref.dtype)


def classifier_softmax(h, weight, bias, *, out_dtype=jnp.bfloat16):
    """h: [rows, H] f32; weight: [H, V] f32; bias: [V] f32 -> probs [rows, V]."""
    rows, H = h.shape
    V = weight.shape[1]

    # Row tiling: large tiles amortize per-step overhead; weight/bias blocks
    # have constant index_maps so they stay resident in VMEM across tiles.
    TM = 256 if rows >= 256 else _round_up(rows, 8)
    rows_p = _round_up(rows, TM)
    h_p = h if rows_p == rows else jnp.pad(h, ((0, rows_p - rows), (0, 0)))

    w_b = weight.astype(jnp.bfloat16)      # bf16 weight stream -> MXU operand
    b2d = bias.reshape(1, V).astype(jnp.float32)

    out = pl.pallas_call(
        _classifier_softmax_kernel,
        out_shape=jax.ShapeDtypeStruct((rows_p, V), out_dtype),
        grid_spec=pltpu.PrefetchScalarGridSpec(
            num_scalar_prefetch=0,
            grid=(rows_p // TM,),
            in_specs=[
                pl.BlockSpec((TM, H), lambda i: (i, 0)),   # hidden row tile
                pl.BlockSpec((H, V), lambda i: (0, 0)),    # weight resident
                pl.BlockSpec((1, V), lambda i: (0, 0)),    # bias resident
            ],
            out_specs=pl.BlockSpec((TM, V), lambda i: (i, 0)),
        ),
        compiler_params=pltpu.CompilerParams(
            dimension_semantics=("parallel",),             # shardable row axis
            vmem_limit_bytes=32 * 1024 * 1024,
        ),
    )(h_p, w_b, b2d)

    return out[:rows]


# ---------------------------------------------------------------------------
# RNNDecoder.forward (dense-tensor path).
# ---------------------------------------------------------------------------
def rnn_decoder_forward(params, x, states=None):
    """x: [B, S, E] f32; states: optional [B, H] f32.
    Returns dict(states=[B,H], hidden=[B,S,H], probs=[B,S,V])."""
    B, S, _ = x.shape
    H = params["w_hh"].shape[-1]
    if states is None:
        states = jnp.zeros((B, H), jnp.float32)

    out, h_final = gru_forward(x, states, params["w_ih"], params["w_hh"],
                               params["b_ih"], params["b_hh"])
    probs = classifier_softmax(out.reshape(B * S, H),
                               params["w_cls"], params["b_cls"])
    return {"states": h_final,
            "hidden": out,
            "probs": probs.reshape(B, S, -1)}


def init_params(key, embed_size, hidden_size, vocab_size):
    ks = jax.random.split(key, 6)
    s_e = 1.0 / jnp.sqrt(embed_size)
    s_h = 1.0 / jnp.sqrt(hidden_size)
    return {
        "w_ih": jax.random.normal(ks[0], (3, embed_size, hidden_size), jnp.float32) * s_e,
        "w_hh": jax.random.normal(ks[1], (3, hidden_size, hidden_size), jnp.float32) * s_h,
        "b_ih": jax.random.normal(ks[2], (3, 1, hidden_size), jnp.float32) * 0.01,
        "b_hh": jax.random.normal(ks[3], (3, 1, hidden_size), jnp.float32) * 0.01,
        "w_cls": jax.random.normal(ks[4], (hidden_size, vocab_size), jnp.float32) * s_h,
        "b_cls": jax.random.normal(ks[5], (vocab_size,), jnp.float32) * 0.01,
    }


if __name__ == "__main__":
    batch, seq, embed_size, hidden_size, vocab_size = 2, 8, 32, 32, 128

    key = jax.random.PRNGKey(0)
    kp, kx = jax.random.split(key)
    params = init_params(kp, embed_size, hidden_size, vocab_size)
    x = jax.random.normal(kx, (batch, seq, embed_size), dtype=jnp.float32)

    out = rnn_decoder_forward(params, x)
    jax.block_until_ready(out)

    assert out["probs"].shape == (batch, seq, vocab_size)
    assert out["hidden"].shape == (batch, seq, hidden_size)
    assert out["states"].shape == (batch, hidden_size)

    # Sanity: softmax rows sum to ~1 (bf16 output + approx reciprocal => loose tol).
    row_sums = jnp.sum(out["probs"].astype(jnp.float32), axis=-1)
    assert bool(jnp.allclose(row_sums, 1.0, atol=2e-2))
    assert bool(jnp.all(jnp.isfinite(out["hidden"])))
    assert bool(jnp.all(jnp.isfinite(out["states"])))

    print("KERNEL_OK")
</pallas_src>

<mosaic_0001>
module attributes {stable_mosaic.version = 11 : i64} {
  func.func @_gru_kernel(%arg0: i32, %arg1: memref<1x2x32xf32, #tpu.memory_space<vmem>>, %arg2: memref<3x32x32xbf16, #tpu.memory_space<vmem>>, %arg3: memref<3x32x32xbf16, #tpu.memory_space<vmem>>, %arg4: memref<3x1x32xf32, #tpu.memory_space<vmem>>, %arg5: memref<3x1x32xf32, #tpu.memory_space<vmem>>, %arg6: memref<2x32xf32, #tpu.memory_space<vmem>>, %arg7: memref<1x2x32xf32, #tpu.memory_space<vmem>>, %arg8: memref<2x32xf32, #tpu.memory_space<vmem>>, %arg9: memref<2x32xf32, #tpu.memory_space<vmem>>) attributes {dimension_semantics = [#tpu.dimension_semantics<arbitrary>], iteration_bounds = array<i64: 8>, scalar_prefetch = 0 : i64, scratch_operands = 1 : i64, tpu.core_type = #tpu.core_type<tc>, window_params = [{transform_indices = @transform_0, window_bounds = array<i64: 1, 2, 32>}, {pipeline_mode = #tpu.pipeline_mode<synchronous>, transform_indices = @transform_1, window_bounds = array<i64: 3, 32, 32>}, {pipeline_mode = #tpu.pipeline_mode<synchronous>, transform_indices = @transform_2, window_bounds = array<i64: 3, 32, 32>}, {pipeline_mode = #tpu.pipeline_mode<synchronous>, transform_indices = @transform_3, window_bounds = array<i64: 3, 1, 32>}, {pipeline_mode = #tpu.pipeline_mode<synchronous>, transform_indices = @transform_4, window_bounds = array<i64: 3, 1, 32>}, {pipeline_mode = #tpu.pipeline_mode<synchronous>, transform_indices = @transform_5, window_bounds = array<i64: 2, 32>}, {transform_indices = @transform_6, window_bounds = array<i64: 1, 2, 32>}, {pipeline_mode = #tpu.pipeline_mode<synchronous>, transform_indices = @transform_7, window_bounds = array<i64: 2, 32>}]} {
    %c0_i32 = arith.constant 0 : i32
    %0 = arith.cmpi eq, %arg0, %c0_i32 : i32
    %1 = arith.extui %0 : i1 to i32
    %c0_i32_0 = arith.constant 0 : i32
    %2 = arith.cmpi ne, %1, %c0_i32_0 : i32
    scf.if %2 {
      %c0_54 = arith.constant 0 : index
      %c0_55 = arith.constant 0 : index
      %75 = vector.load %arg6[%c0_54, %c0_55] : memref<2x32xf32, #tpu.memory_space<vmem>>, vector<2x32xf32>
      %c0_56 = arith.constant 0 : index
      %c0_57 = arith.constant 0 : index
      %76 = vector.load %arg9[%c0_56, %c0_57] : memref<2x32xf32, #tpu.memory_space<vmem>>, vector<2x32xf32>
      tpu.vector_store %arg9[%c0_56, %c0_57], %75 {strides = array<i32>} : memref<2x32xf32, #tpu.memory_space<vmem>>, vector<2x32xf32>,
    } else {
    }
    %c0 = arith.constant 0 : index
    %c0_1 = arith.constant 0 : index
    %c0_2 = arith.constant 0 : index
    %3 = vector.load %arg1[%c0, %c0_1, %c0_2] : memref<1x2x32xf32, #tpu.memory_space<vmem>>, vector<1x2x32xf32>
    %4 = vector.shape_cast %3 : vector<1x2x32xf32> to vector<2x32xf32>
    %5 = arith.truncf %4 : vector<2x32xf32> to vector<2x32xbf16>
    %c0_3 = arith.constant 0 : index
    %c0_4 = arith.constant 0 : index
    %6 = vector.load %arg9[%c0_3, %c0_4] : memref<2x32xf32, #tpu.memory_space<vmem>>, vector<2x32xf32>
    %7 = arith.truncf %6 : vector<2x32xf32> to vector<2x32xbf16>
    %c0_5 = arith.constant 0 : index
    %c0_6 = arith.constant 0 : index
    %c0_7 = arith.constant 0 : index
    %8 = vector.load %arg2[%c0_5, %c0_6, %c0_7] : memref<3x32x32xbf16, #tpu.memory_space<vmem>>, vector<1x32x32xbf16>
    %9 = vector.shape_cast %8 : vector<1x32x32xbf16> to vector<32x32xbf16>
    %cst = arith.constant dense<0.000000e+00> : vector<2x32xf32>
    %10 = tpu.matmul %5, %9, %cst {dimension_numbers = #tpu.dot_dimension_numbers<[1], [0], [0], [1], [0, 0, 1, 1], [], []>} : vector<2x32xbf16>, vector<32x32xbf16>, vector<2x32xf32> -> vector<2x32xf32>
    %c0_8 = arith.constant 0 : index
    %c0_9 = arith.constant 0 : index
    %c0_10 = arith.constant 0 : index
    %11 = vector.load %arg4[%c0_8, %c0_9, %c0_10] : memref<3x1x32xf32, #tpu.memory_space<vmem>>, vector<1x1x32xf32>
    %12 = vector.shape_cast %11 : vector<1x1x32xf32> to vector<1x32xf32>
    %13 = vector.broadcast %12 : vector<1x32xf32> to vector<2x32xf32>
    %14 = arith.addf %10, %13 : vector<2x32xf32>
    %c0_11 = arith.constant 0 : index
    %c0_12 = arith.constant 0 : index
    %c0_13 = arith.constant 0 : index
    %15 = vector.load %arg3[%c0_11, %c0_12, %c0_13] : memref<3x32x32xbf16, #tpu.memory_space<vmem>>, vector<1x32x32xbf16>
    %16 = vector.shape_cast %15 : vector<1x32x32xbf16> to vector<32x32xbf16>
    %cst_14 = arith.constant dense<0.000000e+00> : vector<2x32xf32>
    %17 = tpu.matmul %7, %16, %cst_14 {dimension_numbers = #tpu.dot_dimension_numbers<[1], [0], [0], [1], [0, 0, 1, 1], [], []>} : vector<2x32xbf16>, vector<32x32xbf16>, vector<2x32xf32> -> vector<2x32xf32>
    %c0_15 = arith.constant 0 : index
    %c0_16 = arith.constant 0 : index
    %c0_17 = arith.constant 0 : index
    %18 = vector.load %arg5[%c0_15, %c0_16, %c0_17] : memref<3x1x32xf32, #tpu.memory_space<vmem>>, vector<1x1x32xf32>
    %19 = vector.shape_cast %18 : vector<1x1x32xf32> to vector<1x32xf32>
    %20 = vector.broadcast %19 : vector<1x32xf32> to vector<2x32xf32>
    %21 = arith.addf %17, %20 : vector<2x32xf32>
    %c1 = arith.constant 1 : index
    %c0_18 = arith.constant 0 : index
    %c0_19 = arith.constant 0 : index
    %22 = vector.load %arg2[%c1, %c0_18, %c0_19] : memref<3x32x32xbf16, #tpu.memory_space<vmem>>, vector<1x32x32xbf16>
    %23 = vector.shape_cast %22 : vector<1x32x32xbf16> to vector<32x32xbf16>
    %cst_20 = arith.constant dense<0.000000e+00> : vector<2x32xf32>
    %24 = tpu.matmul %5, %23, %cst_20 {dimension_numbers = #tpu.dot_dimension_numbers<[1], [0], [0], [1], [0, 0, 1, 1], [], []>} : vector<2x32xbf16>, vector<32x32xbf16>, vector<2x32xf32> -> vector<2x32xf32>
    %c1_21 = arith.constant 1 : index
    %c0_22 = arith.constant 0 : index
    %c0_23 = arith.constant 0 : index
    %25 = vector.load %arg4[%c1_21, %c0_22, %c0_23] : memref<3x1x32xf32, #tpu.memory_space<vmem>>, vector<1x1x32xf32>
    %26 = vector.shape_cast %25 : vector<1x1x32xf32> to vector<1x32xf32>
    %27 = vector.broadcast %26 : vector<1x32xf32> to vector<2x32xf32>
    %28 = arith.addf %24, %27 : vector<2x32xf32>
    %c1_24 = arith.constant 1 : index
    %c0_25 = arith.constant 0 : index
    %c0_26 = arith.constant 0 : index
    %29 = vector.load %arg3[%c1_24, %c0_25, %c0_26] : memref<3x32x32xbf16, #tpu.memory_space<vmem>>, vector<1x32x32xbf16>
    %30 = vector.shape_cast %29 : vector<1x32x32xbf16> to vector<32x32xbf16>
    %cst_27 = arith.constant dense<0.000000e+00> : vector<2x32xf32>
    %31 = tpu.matmul %7, %30, %cst_27 {dimension_numbers = #tpu.dot_dimension_numbers<[1], [0], [0], [1], [0, 0, 1, 1], [], []>} : vector<2x32xbf16>, vector<32x32xbf16>, vector<2x32xf32> -> vector<2x32xf32>
    %c1_28 = arith.constant 1 : index
    %c0_29 = arith.constant 0 : index
    %c0_30 = arith.constant 0 : index
    %32 = vector.load %arg5[%c1_28, %c0_29, %c0_30] : memref<3x1x32xf32, #tpu.memory_space<vmem>>, vector<1x1x32xf32>
    %33 = vector.shape_cast %32 : vector<1x1x32xf32> to vector<1x32xf32>
    %34 = vector.broadcast %33 : vector<1x32xf32> to vector<2x32xf32>
    %35 = arith.addf %31, %34 : vector<2x32xf32>
    %c2 = arith.constant 2 : index
    %c0_31 = arith.constant 0 : index
    %c0_32 = arith.constant 0 : index
    %36 = vector.load %arg2[%c2, %c0_31, %c0_32] : memref<3x32x32xbf16, #tpu.memory_space<vmem>>, vector<1x32x32xbf16>
    %37 = vector.shape_cast %36 : vector<1x32x32xbf16> to vector<32x32xbf16>
    %cst_33 = arith.constant dense<0.000000e+00> : vector<2x32xf32>
    %38 = tpu.matmul %5, %37, %cst_33 {dimension_numbers = #tpu.dot_dimension_numbers<[1], [0], [0], [1], [0, 0, 1, 1], [], []>} : vector<2x32xbf16>, vector<32x32xbf16>, vector<2x32xf32> -> vector<2x32xf32>
    %c2_34 = arith.constant 2 : index
    %c0_35 = arith.constant 0 : index
    %c0_36 = arith.constant 0 : index
    %39 = vector.load %arg4[%c2_34, %c0_35, %c0_36] : memref<3x1x32xf32, #tpu.memory_space<vmem>>, vector<1x1x32xf32>
    %40 = vector.shape_cast %39 : vector<1x1x32xf32> to vector<1x32xf32>
    %41 = vector.broadcast %40 : vector<1x32xf32> to vector<2x32xf32>
    %42 = arith.addf %38, %41 : vector<2x32xf32>
    %c2_37 = arith.constant 2 : index
    %c0_38 = arith.constant 0 : index
    %c0_39 = arith.constant 0 : index
    %43 = vector.load %arg3[%c2_37, %c0_38, %c0_39] : memref<3x32x32xbf16, #tpu.memory_space<vmem>>, vector<1x32x32xbf16>
    %44 = vector.shape_cast %43 : vector<1x32x32xbf16> to vector<32x32xbf16>
    %cst_40 = arith.constant dense<0.000000e+00> : vector<2x32xf32>
    %45 = tpu.matmul %7, %44, %cst_40 {dimension_numbers = #tpu.dot_dimension_numbers<[1], [0], [0], [1], [0, 0, 1, 1], [], []>} : vector<2x32xbf16>, vector<32x32xbf16>, vector<2x32xf32> -> vector<2x32xf32>
    %c2_41 = arith.constant 2 : index
    %c0_42 = arith.constant 0 : index
    %c0_43 = arith.constant 0 : index
    %46 = vector.load %arg5[%c2_41, %c0_42, %c0_43] : memref<3x1x32xf32, #tpu.memory_space<vmem>>, vector<1x1x32xf32>
    %47 = vector.shape_cast %46 : vector<1x1x32xf32> to vector<1x32xf32>
    %48 = vector.broadcast %47 : vector<1x32xf32> to vector<2x32xf32>
    %49 = arith.addf %45, %48 : vector<2x32xf32>
    %50 = arith.addf %14, %21 : vector<2x32xf32>
    %51 = arith.negf %50 : vector<2x32xf32>
    %52 = math.exp %51 : vector<2x32xf32>
    %cst_44 = arith.constant 1.000000e+00 : f32
    %53 = vector.broadcast %cst_44 : f32 to vector<2x32xf32>
    %54 = arith.addf %53, %52 : vector<2x32xf32>
    %55 = arith.divf %53, %54 : vector<2x32xf32>
    %56 = arith.addf %28, %35 : vector<2x32xf32>
    %57 = arith.negf %56 : vector<2x32xf32>
    %58 = math.exp %57 : vector<2x32xf32>
    %cst_45 = arith.constant 1.000000e+00 : f32
    %59 = vector.broadcast %cst_45 : f32 to vector<2x32xf32>
    %60 = arith.addf %59, %58 : vector<2x32xf32>
    %61 = arith.divf %59, %60 : vector<2x32xf32>
    %62 = arith.mulf %55, %49 : vector<2x32xf32>
    %63 = arith.addf %42, %62 : vector<2x32xf32>
    %64 = math.tanh %63 : vector<2x32xf32>
    %cst_46 = arith.constant 1.000000e+00 : f32
    %65 = vector.broadcast %cst_46 : f32 to vector<2x32xf32>
    %66 = arith.subf %65, %61 : vector<2x32xf32>
    %67 = arith.mulf %66, %64 : vector<2x32xf32>
    %68 = arith.mulf %61, %6 : vector<2x32xf32>
    %69 = arith.addf %67, %68 : vector<2x32xf32>
    %c0_47 = arith.constant 0 : index
    %c0_48 = arith.constant 0 : index
    %70 = vector.load %arg9[%c0_47, %c0_48] : memref<2x32xf32, #tpu.memory_space<vmem>>, vector<2x32xf32>
    tpu.vector_store %arg9[%c0_47, %c0_48], %69 {strides = array<i32>} : memref<2x32xf32, #tpu.memory_space<vmem>>, vector<2x32xf32>,
    %c0_49 = arith.constant 0 : index
    %c0_50 = arith.constant 0 : index
    %c0_51 = arith.constant 0 : index
    %71 = vector.load %arg7[%c0_49, %c0_50, %c0_51] : memref<1x2x32xf32, #tpu.memory_space<vmem>>, vector<1x2x32xf32>
    %72 = vector.shape_cast %71 : vector<1x2x32xf32> to vector<2x32xf32>
    %73 = vector.shape_cast %69 : vector<2x32xf32> to vector<1x2x32xf32>
    tpu.vector_store %arg7[%c0_49, %c0_50, %c0_51], %73 {strides = array<i32>} : memref<1x2x32xf32, #tpu.memory_space<vmem>>, vector<1x2x32xf32>,
    %c0_52 = arith.constant 0 : index
    %c0_53 = arith.constant 0 : index
    %74 = vector.load %arg8[%c0_52, %c0_53] : memref<2x32xf32, #tpu.memory_space<vmem>>, vector<2x32xf32>
    tpu.vector_store %arg8[%c0_52, %c0_53], %69 {strides = array<i32>} : memref<2x32xf32, #tpu.memory_space<vmem>>, vector<2x32xf32>,
    return
  }
  func.func @transform_0(%arg0: i32) -> (i32, i32, i32) {
    %c0_i32 = arith.constant 0 : i32
    %c0_i32_0 = arith.constant 0 : i32
    %c0_i32_1 = arith.constant 0 : i32
    return %arg0, %c0_i32, %c0_i32_0 : i32, i32, i32
  }
  func.func @transform_1(%arg0: i32) -> (i32, i32, i32) {
    %c0_i32 = arith.constant 0 : i32
    %c0_i32_0 = arith.constant 0 : i32
    %c0_i32_1 = arith.constant 0 : i32
    %c0_i32_2 = arith.constant 0 : i32
    return %c0_i32, %c0_i32_0, %c0_i32_1 : i32, i32, i32
  }
  func.func @transform_2(%arg0: i32) -> (i32, i32, i32) {
    %c0_i32 = arith.constant 0 : i32
    %c0_i32_0 = arith.constant 0 : i32
    %c0_i32_1 = arith.constant 0 : i32
    %c0_i32_2 = arith.constant 0 : i32
    return %c0_i32, %c0_i32_0, %c0_i32_1 : i32, i32, i32
  }
  func.func @transform_3(%arg0: i32) -> (i32, i32, i32) {
    %c0_i32 = arith.constant 0 : i32
    %c0_i32_0 = arith.constant 0 : i32
    %c0_i32_1 = arith.constant 0 : i32
    %c0_i32_2 = arith.constant 0 : i32
    return %c0_i32, %c0_i32_0, %c0_i32_1 : i32, i32, i32
  }
  func.func @transform_4(%arg0: i32) -> (i32, i32, i32) {
    %c0_i32 = arith.constant 0 : i32
    %c0_i32_0 = arith.constant 0 : i32
    %c0_i32_1 = arith.constant 0 : i32
    %c0_i32_2 = arith.constant 0 : i32
    return %c0_i32, %c0_i32_0, %c0_i32_1 : i32, i32, i32
  }
  func.func @transform_5(%arg0: i32) -> (i32, i32) {
    %c0_i32 = arith.constant 0 : i32
    %c0_i32_0 = arith.constant 0 : i32
    %c0_i32_1 = arith.constant 0 : i32
    return %c0_i32, %c0_i32_0 : i32, i32
  }
  func.func @transform_6(%arg0: i32) -> (i32, i32, i32) {
    %c0_i32 = arith.constant 0 : i32
    %c0_i32_0 = arith.constant 0 : i32
    %c0_i32_1 = arith.constant 0 : i32
    return %arg0, %c0_i32, %c0_i32_0 : i32, i32, i32
  }
  func.func @transform_7(%arg0: i32) -> (i32, i32) {
    %c0_i32 = arith.constant 0 : i32
    %c0_i32_0 = arith.constant 0 : i32
    %c0_i32_1 = arith.constant 0 : i32
    return %c0_i32, %c0_i32_0 : i32, i32
  }
}

</mosaic_0001>

<bundles_post_ra>
// kernel: tpu_custom_call.1
= control target key start
LH: loop header
LB: loop body
LE: loop exit
PB: predicated region body
PF: predicated region fallthrough
CT: control target
= control target key end

     0   :  { %13 = vsyncpa [#allocation4], 0  ;;  %s1635_s0 = inlined_call_operand.hbm [shape: f32[8,2,32], index: 0, kind: input, shape index: {}]   ;;  %s1636_s1 = inlined_call_operand.hbm [shape: bf16[3,32,32], index: 1, kind: input, shape index: {}]   ;;  %s1637_s2 = inlined_call_operand.hbm [shape: bf16[3,32,32], index: 2, kind: input, shape index: {}]   ;;  %s1638_s3 = inlined_call_operand.vmem [shape: f32[3,1,32], index: 3, kind: input, shape index: {}]   ;;  %s1639_s4 = inlined_call_operand.vmem [shape: f32[3,1,32], index: 4, kind: input, shape index: {}]   ;;  %s1640_s5 = inlined_call_operand.vmem [shape: f32[2,32], index: 5, kind: input, shape index: {}]   ;;  %s1641_s6 = inlined_call_operand.hbm [shape: f32[8,2,32], index: 6, kind: output, shape index: {0}]   ;;  %s1642_s7 = inlined_call_operand.hbm [shape: f32[2,32], index: 7, kind: output, shape index: {1}]  }
   0x1   :  { %15 = vsyncpa [#allocation4 + $0x1], 0 }
   0x2   :  { %16 = vsyncpa [#allocation7], 0 }
   0x3   :  { %17 = vsyncpa [#allocation5], 0 }
   0x4   :  { %19 = vsyncpa [#allocation5 + $0x1], 0 }
   0x5   :  { %20 = vsyncpa [#allocation11], 0  ;;  %s1341_s24 = smov 0   ;;  %s1343_s25 = smov 0  }
   0x6   :  { %s1345_s26 = smov 0   ;;  %s1347_s27 = smov 0  }
   0x7 LB: > { %s1362_s28 = sadd.s32 4294967295, %s1290_s27   ;;  %s877_s29 = sadd.s32 4294967294, %s1290_s27   ;;  %s1290_s27 = sphi %s1347_s27, %s1666_s27   ;;  %s1286_s26 = sphi %s1345_s26, %s1665_s26   ;;  %s1282_s25 = sphi %s1343_s25, %s1664_s25   ;;  %s1278_s24 = sphi %s1341_s24, %s1663_s24  }
   0x8   : > { %p46_p0 = scmp.ne.s32.totalorder %s1282_s25, %s1278_s24  ;;  %p1643_p1 = scmp.eq.s32.totalorder %s1362_s28, 0 }
   0x9   : > { %p181_p3 = scmp.eq.s32.totalorder %s877_s29, 7  ;;  %p878_p5 = scmp.ge.s32.totalorder %s1290_s27, 1 }
   0xa   : > { %p1371_p4 = por %p1643_p1, %p46_p0  ;;  %p209_p7 = scmp.lt.s32.totalorder %s1290_s27, 9 }
   0xb   : > { %p1376_p6 = por %p181_p3, %p46_p0  ;;  %s1292_s10 = smov [#allocation6]  }
   0xc   : > { %s1646_s30 = scalar_select %p1371_p4, 1, 0 }
   0xd   : > { %s1647_s8 = scalar_select %p1376_p6, 1, 0 }
   0xe   : > { %p1382_p9 = pnand %p878_p5, %p209_p7  ;;  %s221_s11 = sshll.u32 %s1292_s10, 4  ;;  %s222_s11 = int_to_ptr.vmem [resolvable:$true] %s221_s11 }
   0xf   : > { %s1293_s13 = smov [#allocation8]   ;;  %s1104_s17 = scalar_lea.hbm %s1636_s1, 768 }
  0x10   : > { %s1648_s9 = scalar_select %p1382_p9, 1, 0 }
  0x11   : > { %p1020_p10 = pneg %p1382_p9  ;;  %s234_s14 = sshll.u32 %s1293_s13, 4  ;;  %s1394_s14 = int_to_ptr.vmem [resolvable:$true] %s234_s14 }
  0x12   : > { %p1105_p12 = scmp.ne.s32.totalorder %s1636_s1, %s1104_s17  ;;  %p1111_p5 = scmp.lt.u32.totalorder %s1104_s17, %s1636_s1 }
  0x13   : > { %p1390_p11 = pnand %p1020_p10, %p1643_p1 }
  0x15   : > { %p1106_p13 = pneg %p1390_p11 }
  0x17   : > { %p1107_p0 = pnand %p1106_p13, %p1105_p12 }
  0x19   : > { %p1108_p3 = pneg %p1107_p0 }
  0x1b   : > { %p1113_p7 = pnand %p1111_p5, %p1108_p3 }
  0x1d   : > { %1116 = shalt.err (!%p1113_p7)
}
  0x1e   : > { %s1117_s22 = scalar_lea.vmem %s222_s11, 768  ;;  %p1125_p2 = scmp.lt.s32.totalorder %s222_s11, %s222_s11 }
  0x1f   : > { %p1118_p10 = scmp.ne.s32.totalorder %s222_s11, %s1117_s22  ;;  %p1126_p6 = scmp.lt.s32.totalorder %s1117_s22, %s1117_s22 }
  0x21   : > { %p1120_p8 = pnand %p1118_p10, %p1106_p13  ;;  %p1127_p4 = por %p1126_p6, %p1125_p2 }
  0x23   : > { %p1121_p1 = pneg %p1120_p8 }
  0x25   : > { %p1128_p9 = pnand %p1127_p4, %p1121_p1 }
  0x27   : > { %1131 = shalt.err (!%p1128_p9)
}
  0x28   : > { %s1294_s23 = smov 64   ;;  %s1295_s29 = smov 4  }
  0x29   : > { %1023 = dma.hbm_to_vmem [thread:$0]  (!%p1390_p11), %s1636_s1, 768, %s222_s11, [#allocation7], %s1294_s23, %s1294_s23, %s1295_s29  }
  0x2a   : > { %s1132_s17 = scalar_lea.hbm %s1637_s2, 768 }
  0x2b   : > { %p1133_p8 = scmp.ne.s32.totalorder %s1637_s2, %s1132_s17  ;;  %p1139_p4 = scmp.lt.u32.totalorder %s1132_s17, %s1637_s2 }
  0x2d   : > { %p1135_p1 = pnand %p1133_p8, %p1106_p13 }
  0x2f   : > { %p1136_p2 = pneg %p1135_p1 }
  0x31   : > { %p1141_p6 = pnand %p1139_p4, %p1136_p2 }
  0x33   : > { %1144 = shalt.err (!%p1141_p6)
}
  0x34   : > { %s1145_s11 = scalar_lea.vmem %s1394_s14, 768  ;;  %p1153_p3 = scmp.lt.s32.totalorder %s1394_s14, %s1394_s14 }
  0x35   : > { %p1146_p9 = scmp.ne.s32.totalorder %s1394_s14, %s1145_s11  ;;  %p1154_p5 = scmp.lt.s32.totalorder %s1145_s11, %s1145_s11 }
  0x37   : > { %p1148_p12 = pnand %p1146_p9, %p1106_p13  ;;  %p1155_p7 = por %p1154_p5, %p1153_p3 }
  0x39   : > { %p1149_p0 = pneg %p1148_p12 }
  0x3b   : > { %p1156_p10 = pnand %p1155_p7, %p1149_p0 }
  0x3d   : > { %1159 = shalt.err (!%p1156_p10)
}
  0x3e   : > { %1026 = dma.hbm_to_vmem [thread:$0]  (!%p1390_p11), %s1637_s2, 768, %s1394_s14, [#allocation7], %s1294_s23, %s1294_s23, %s1295_s29  }
  0x3f   : > { %s1444_s13 = sadd.s32 1, %s1290_s27   ;;  %s33_s12 = sadd.s32 1, %s1286_s26 }
  0x40   : > { %s30_s15 = ssub.s32 %s1290_s27, %s1444_s13  ;;  %p40_p13 = scmp.ne.s32.totalorder %s1286_s26, %s1282_s25 }
  0x41   : > { %p31_p8 = scmp.eq.s32.totalorder %s30_s15, 0  ;;  %p41_p1 = scmp.eq.s32.totalorder %s1290_s27, 0 }
  0x42   : > { %p1650_p2 = scmp.eq.s32.totalorder %s1362_s28, 7  ;;  %p1037_p6 = scmp.lt.s32.totalorder %s1290_s27, 8 }
  0x43   : > { %s1460_s17 = scalar_select %p31_p8, %s1286_s26, %s33_s12  }
  0x44   : > { %p1454_p4 = por %p1650_p2, %p40_p13  ;;  %p42_p9 = por %p41_p1, %p40_p13 }
  0x45   : > { %s257_s18 = sand.u32 1, %s1286_s26   ;;  %s883_s14 = sshll.u32 %s1290_s27, 5 }
  0x46   : > { %s882_s19 = sshll.u32 %s257_s18, 1  ;;  %s1467_s20 = scalar_lea.hbm %s1635_s0, %s883_s14 }
  0x47   : > { %s261_s21 = scalar_lea.vmem [#allocation3], %s882_s19  ;;  %p1471_p11 = pnand %p1037_p6, %p42_p9 }
  0x48   : > { %s268_s11 = sshll.u32 %s261_s21, 4  ;;  %s258_s10 = scalar_lea.sflag [#allocation4], %s257_s18  ;;  %s1469_s11 = int_to_ptr.vmem [resolvable:$true] %s268_s11 }
  0x49   : > { %s1160_s12 = scalar_lea.hbm %s1467_s20, 32  ;;  %p1162_p0 = pneg %p1471_p11 }
  0x4a   : > { %p1161_p12 = scmp.ne.s32.totalorder %s1467_s20, %s1160_s12  ;;  %s1165_s14 = scalar_lea.hbm %s1635_s0, 256 }
  0x4b   : > { %p1166_p7 = scmp.lt.u32.totalorder %s1467_s20, %s1635_s0  ;;  %p1167_p10 = scmp.lt.u32.totalorder %s1165_s14, %s1160_s12 }
  0x4c   : > { %p1163_p3 = pnand %p1162_p0, %p1161_p12  ;;  %p1169_p8 = scmp.lt.u32.totalorder %s1160_s12, %s1467_s20 }
  0x4d   : > { %p1168_p13 = por %p1167_p10, %p1166_p7 }
  0x4e   : > { %p1164_p5 = pneg %p1163_p3 }
  0x4f   : > { %p1170_p1 = por %p1169_p8, %p1168_p13 }
  0x51   : > { %p1171_p2 = pnand %p1170_p1, %p1164_p5 }
  0x53   : > { %1174 = shalt.err (!%p1171_p2)
}
  0x54   : > { %s1175_s18 = scalar_lea.vmem %s1469_s11, 32  ;;  %s1296_s21 = smov [#allocation3]  }
  0x55   : > { %p1176_p6 = scmp.ne.s32.totalorder %s1469_s11, %s1175_s18  ;;  %s1180_s15 = sshll.u32 %s1296_s21, 4  ;;  %s1181_s15 = int_to_ptr.vmem [resolvable:$false] %s1180_s15 }
  0x56   : > { %s1182_s19 = scalar_lea.vmem %s1181_s15, 64  ;;  %p1183_p3 = scmp.lt.s32.totalorder %s1469_s11, %s1181_s15 }
  0x57   : > { %p1178_p9 = pnand %p1176_p6, %p1162_p0  ;;  %p1184_p7 = scmp.lt.s32.totalorder %s1182_s19, %s1175_s18 }
  0x59   : > { %p1179_p12 = pneg %p1178_p9  ;;  %p1185_p10 = por %p1184_p7, %p1183_p3 }
  0x5b   : > { %p1186_p13 = pnand %p1185_p10, %p1179_p12 }
  0x5d   : > { %1189 = shalt.err (!%p1186_p13)
}
  0x5e   : > { %1030 = dma.hbm_to_vmem [thread:$0]  (!%p1471_p11), %s1467_s20, 32, %s1469_s11, %s258_s10  }
  0x5f   : > { %p1653_p5 = scmp.ne.s32.totalorder %s1648_s9, 0 }
  0x60   : > { %s1503_s12 = sand.u32 (!%p1653_p5), 1, %s1282_s25   ;;  %p1654_p0 = scmp.ne.s32.totalorder (!%p1653_p5), %s1646_s30, 0 }
  0x61   : > { %277 = sbr.rel (%p1653_p5) target bundleno = 438 (0x1b6), region = 44  ;;  %s885_s14 = sshll.u32 (!%p1653_p5), %s1503_s12, 1 }
  0x62   : > { %s280_s23 = scalar_lea.sflag (!%p1653_p5), [#allocation4], %s1503_s12  ;;  %s283_s29 = scalar_lea.vmem (!%p1653_p5), [#allocation3], %s885_s14 }
  0x68   : > { %1261 = dma.done.wait (%p1654_p0), %s280_s23, 32  }
  0x69   : > { %1263 = vsyncadd (%p1654_p0), %s280_s23, 4294967264  ;;  %p1655_p8 = scmp.eq.s32.totalorder %s1362_s28, 0 }
  0x6b   : > { %1265 = dma.done.wait (%p1655_p8), [#allocation7], 1536   ;;  %p1656_p11 = pmov %p1655_p8 }
  0x6c   : > { %s1515_s9 = scalar_lea.vmem [#allocation9], %s885_s14  ;;  %p1657_p1 = scmp.ne.s32.totalorder %s1362_s28, 0 }
  0x6d   : > { %1267 = vsyncadd (%p1656_p11), [#allocation7], 4294965760  ;;  %v327_v0 = vld [vmem:[%s1640_s5] sm:$0x3] (!%p1657_p1)  ;;  %vm328_vm0 = vcmask (!%p1657_p1), 254976  }
  0x6e   : > { %326 = sbr.rel (%p1657_p1) target bundleno = 117 (0x75), region = 60  ;;  %329 = vst.msk [vmem:[#allocation2] sm:$0x3] (!%p1657_p1), %vm328_vm0, %v327_v0 }
  0x75 PF: > { %v1082_v1 = vld [vmem:[#allocation6] sm:$0xff]   ;;  %v1297_v2 = vmov 0.0   ;;  %v1083_v3 = vld [vmem:[#allocation6 + $0x10] sm:$0xff]   ;;  %v1084_v4 = vld [vmem:[#allocation6 + $0x8] sm:$0xff]   ;;  %vm1298_vm1 = vmmov 0   ;;  %vm357_vm2 = vcmask 261120  }
  0x76   : > { %944 = vmatprep.subr.bf16.mxu0 %v1297_v2  ;;  %960 = vmatprep.subr.bf16.mxu1 %v1297_v2  ;;  %v1085_v5 = vld [vmem:[#allocation6 + $0x18] sm:$0xff]   ;;  %v1086_v8 = vld [vmem:[#allocation8] sm:$0xff]   ;;  %v1087_v9 = vld [vmem:[#allocation8 + $0x10] sm:$0xff]   ;;  %s921_s30 = sshll.u32 %s1362_s28, 5  ;;  %s766_s22 = sshll.u32 %s1515_s9, 4  ;;  %vm748_vm3 = vcmask 254976   ;;  %s1564_s22 = int_to_ptr.vmem [resolvable:$true] %s766_s22 }
  0x77   : > { %945 = vmatpush3.bf16.msra.mxu0 %v1082_v1  ;;  %948 = vmatprep.mubr.msk.bf16.mxu0 %vm1298_vm1, %v1297_v2  ;;  %v330_v6 = vld [vmem:[%s283_s29] sm:$0x3]  ;;  %v1089_v11 = vld [vmem:[#allocation8 + $0x18] sm:$0xff]   ;;  %v1528_v12 = vld [vmem:[#allocation2] sm:$0x3]  ;;  %s1299_s10 = smov [#allocation10]   ;;  %s1562_s19 = scalar_lea.hbm %s1641_s6, %s921_s30 }
  0x78   : > { %961 = vmatpush3.bf16.msra.mxu1 %v1083_v3  ;;  %946 = vmatprep.subr.bf16.mxu0 %v1297_v2  ;;  %v331_v7 = vpack.c.bf16 %v330_v6, %v330_v6  ;;  %v1088_v10 = vld [vmem:[#allocation8 + $0x8] sm:$0xff]   ;;  %v333_v13 = vpack.c.bf16 %v1528_v12, %v1528_v12  ;;  %v1091_v14 = vld [vmem:[#allocation6 + $0x20] sm:$0xff]   ;;  %v1090_v15 = vld [vmem:[#allocation8 + $0x20] sm:$0xff]   ;;  %s777_s18 = sshll.u32 %s1299_s10, 4  ;;  %s753_s14 = scalar_lea.sflag [#allocation5], %s1503_s12  ;;  %s1566_s18 = int_to_ptr.vmem [resolvable:$true] %s777_s18 }
  0x79   : > { %962 = vmatprep.subr.bf16.mxu1 %v1297_v2  ;;  %964 = vmatprep.mubr.msk.bf16.mxu1 %vm1298_vm1, %v1297_v2  ;;  %v1093_v16 = vld [vmem:[#allocation6 + $0x28] sm:$0xff]   ;;  %v1092_v17 = vld [vmem:[#allocation8 + $0x28] sm:$0xff]   ;;  %s1190_s23 = scalar_lea.vmem %s1564_s22, 32  ;;  %s1300_s29 = smov [#allocation9]  }
  0x7a   : > { %v890_v18 = vld [vmem:[%s1638_s3] ss:$0 sm:$0xff]  ;;  %v899_v21 = vld [vmem:[%s1638_s3 + $0x1] ss:$0 sm:$0xff]  ;;  %v914_v47 = vld [vmem:[%s1639_s4 + $0x2] ss:$0 sm:$0xff]  ;;  %p1191_p2 = scmp.ne.s32.totalorder %s1564_s22, %s1190_s23 }
  0x7b   : > { %947 = vmatpush3.bf16.msra.mxu0 %v1084_v4  ;;  %v894_v19 = vld [vmem:[%s1639_s4] ss:$0 sm:$0xff]  ;;  %v904_v22 = vld [vmem:[%s1639_s4 + $0x1] ss:$0 sm:$0xff]  ;;  %v909_v48 = vld [vmem:[%s1638_s3 + $0x2] ss:$0 sm:$0xff] }
  0x7c   : > { %963 = vmatpush3.bf16.msra.mxu1 %v1085_v5  ;;  %952 = vmatprep.subr.bf16.mxu0 %v1297_v2  ;;  %v992_v20 = vadd.f32 %v894_v19, %v890_v18  ;;  %v994_v24 = vadd.f32 %v904_v22, %v899_v21  ;;  %p1192_p6 = pnand %p1191_p2, %p1454_p4  ;;  %s1194_s20 = sshll.u32 %s1300_s29, 4  ;;  %s1195_s20 = int_to_ptr.vmem [resolvable:$false] %s1194_s20 }
  0x7d   : > { %968 = vmatprep.subr.bf16.mxu1 %v1297_v2  ;;  %s1196_s11 = scalar_lea.vmem %s1195_s20, 64  ;;  %p1197_p12 = scmp.lt.s32.totalorder %s1564_s22, %s1195_s20 }
  0x7e   : > { %949 = vmatmul.mubr.msk.bf16.vlgmr.msra.gmra.mrb[0].mxu0 %vm357_vm2, %v331_v7  ;;  %p1193_p9 = pneg %p1192_p6  ;;  %p1198_p3 = scmp.lt.s32.totalorder %s1196_s11, %s1190_s23 }
  0x7f   : > { %965 = vmatmul.mubr.msk.bf16.vlgmr.msra.gmra.mrb[0].mxu1 %vm357_vm2, %v331_v7  ;;  %953 = vmatpush3.bf16.msra.mxu0 %v1086_v8 }
  0x80   : > { %969 = vmatpush3.bf16.msra.mxu1 %v1087_v9  ;;  %954 = vmatprep.subr.bf16.mxu0 %v1297_v2  ;;  %p1199_p7 = por %p1198_p3, %p1197_p12 }
  0x81   : > { %970 = vmatprep.subr.bf16.mxu1 %v1297_v2  ;;  %956 = vmatprep.mubr.msk.bf16.mxu0 %vm1298_vm1, %v1297_v2 }
  0x82   : > { %972 = vmatprep.mubr.msk.bf16.mxu1 %vm1298_vm1, %v1297_v2  ;;  %p1200_p10 = pnand %p1199_p7, %p1193_p9 }
  0x83   : > { %955 = vmatpush3.bf16.msra.mxu0 %v1088_v10 }
  0x84   : > { %971 = vmatpush3.bf16.msra.mxu1 %v1089_v11  ;;  %976 = vmatprep.subr.bf16.mxu0 %v1297_v2 }
  0x85   : > { %984 = vmatprep.subr.bf16.mxu1 %v1297_v2 }
  0x8a   : > { %957 = vmatmul.mubr.msk.bf16.vlgmr.msra.gmra.mrb[0].mxu0 %vm357_vm2, %v333_v13 }
  0x8b   : > { %973 = vmatmul.mubr.msk.bf16.vlgmr.msra.gmra.mrb[0].mxu1 %vm357_vm2, %v333_v13  ;;  %977 = vmatpush3.bf16.msra.mxu0 %v1091_v14 }
  0x8c   : > { %985 = vmatpush3.bf16.msra.mxu1 %v1090_v15  ;;  %978 = vmatprep.subr.bf16.mxu0 %v1297_v2 }
  0x8d   : > { %986 = vmatprep.subr.bf16.mxu1 %v1297_v2  ;;  %988 = vmatprep.mubr.msk.bf16.mxu1 %vm1298_vm1, %v1297_v2 }
  0x8e   : > { %980 = vmatprep.mubr.msk.bf16.mxu0 %vm1298_vm1, %v1297_v2 }
  0x8f   : > { %979 = vmatpush3.bf16.msra.mxu0 %v1093_v16 }
  0x90   : > { %987 = vmatpush3.bf16.msra.mxu1 %v1092_v17 }
  0x92   : > { %981 = vmatmul.mubr.msk.bf16.vlgmr.msra.gmra.mrb[4].mxu0 %vm357_vm2, %v331_v7 }
  0x93   : > { %989 = vmatmul.mubr.msk.bf16.vlgmr.msra.gmra.mrb[4].mxu1 %vm357_vm2, %v333_v13 }
 0x15d   : > { %v461_v23 = vpop.f32.mrb[0].mxu0 }
 0x15e   : > { %v993_v25 = vadd.f32 %v992_v20, %v461_v23  ;;  %v591_v26 = vpop.f32.mrb[0].mxu1  ;;  %v958_v27 = vpop.f32.mrb[1].mxu0 }
 0x15f   : > { %v974_v28 = vpop.f32.mrb[1].mxu1  ;;  %v464_v29 = vpop.f32.mrb[2].mxu0  ;;  %v995_v33 = vadd.f32 %v994_v24, %v591_v26 }
 0x160   : > { %v918_v30 = vmul.f32 -1.442695, %v993_v25  ;;  %v594_v31 = vpop.f32.mrb[2].mxu1  ;;  %v959_v32 = vpop.f32.mrb[3].mxu0 }
 0x161   : > { %v975_v34 = vpop.f32.mrb[3].mxu1  ;;  %v919_v35 = vmul.f32 -1.442695, %v995_v33 }
 0x162   : > { %1094 = vpow2.f32 %v918_v30 }
 0x163   : > { %1096 = vpow2.f32 %v919_v35 }
 0x165   : > { %v656_v36 = vpop.f32.mrb[4].mxu0 }
 0x166   : > { %v721_v37 = vpop.f32.mrb[4].mxu1  ;;  %v982_v38 = vpop.f32.mrb[5].mxu0  ;;  %v657_v51 = vadd.f32 %v909_v48, %v656_v36 }
 0x167   : > { %v990_v39 = vpop.f32.mrb[5].mxu1  ;;  %v659_v40 = vpop.f32.mrb[6].mxu0  ;;  %v722_v50 = vadd.f32 %v914_v47, %v721_v37 }
 0x168   : > { %v724_v41 = vpop.f32.mrb[6].mxu1  ;;  %v983_v42 = vpop.f32.mrb[7].mxu0 }
 0x169   : > { %v991_v43 = vpop.f32.mrb[7].mxu1 }
 0x16c   : > { %v1095_v44 = vpop.eup %1094 }
 0x16d   : > { %v731_v45 = vadd.f32 1.0, %v1095_v44  ;;  %v1097_v46 = vpop.eup %1096 }
 0x16e   : > { %v738_v49 = vadd.f32 1.0, %v1097_v46 }
 0x16f   : > { %1098 = vrcp.f32 %v731_v45 }
 0x170   : > { %1100 = vrcp.f32 %v738_v49 }
 0x179   : > { %v1099_v52 = vpop.eup %1098 }
 0x17a   : > { %v741_v53 = vmul.f32 %v1099_v52, %v722_v50  ;;  %v1101_v55 = vpop.eup %1100 }
 0x17b   : > { %v744_v56 = vsub.f32 1.0, %v1101_v55  ;;  %v746_v59 = vmul.f32 %v1101_v55, %v1528_v12 }
 0x17c   : > { %v742_v54 = vadd.f32 %v741_v53, %v657_v51 }
 0x17e   : > { %1102 = vtanh.f32 %v742_v54 }
 0x188   : > { %v1103_v57 = vpop.eup %1102 }
 0x189   : > { %v745_v58 = vmul.f32 %v1103_v57, %v744_v56 }
 0x18b   : > { %v747_v60 = vadd.f32 %v746_v59, %v745_v58 }
 0x18d   : > { %749 = vst.msk [vmem:[#allocation2] sm:$0x3] %vm748_vm3, %v747_v60  ;;  %750 = vst.msk [vmem:[%s1515_s9] sm:$0x3] %vm748_vm3, %v747_v60 }
 0x18e   : > { %751 = vst.msk [vmem:[#allocation10] sm:$0x3] %vm748_vm3, %v747_v60 }
 0x18f   : > { %1203 = shalt.err (!%p1200_p10)
}
 0x190   : > { %s1204_s12 = scalar_lea.hbm %s1562_s19, 32  ;;  %s1208_s10 = scalar_lea.hbm %s1641_s6, 256 }
 0x191   : > { %p1205_p13 = scmp.ne.s32.totalorder %s1562_s19, %s1204_s12  ;;  %p1209_p8 = scmp.lt.u32.totalorder %s1562_s19, %s1641_s6 }
 0x192   : > { %p1210_p11 = scmp.lt.u32.totalorder %s1208_s10, %s1204_s12  ;;  %p1212_p2 = scmp.lt.u32.totalorder %s1204_s12, %s1562_s19 }
 0x193   : > { %p1206_p5 = pnand %p1205_p13, %p1454_p4 }
 0x194   : > { %p1211_p1 = por %p1210_p11, %p1209_p8 }
 0x195   : > { %p1207_p0 = pneg %p1206_p5 }
 0x196   : > { %p1213_p6 = por %p1212_p2, %p1211_p1 }
 0x198   : > { %p1214_p9 = pnand %p1213_p6, %p1207_p0 }
 0x19a   : > { %1217 = shalt.err (!%p1214_p9)
}
 0x19b   : > { %1014 = dma.vmem_to_hbm [thread:$0]  (%p1454_p4), %s1564_s22, 32, %s1562_s19, %s753_s14  }
 0x19c   : > { %s1218_s23 = scalar_lea.vmem %s1566_s18, 32  ;;  %p1658_p3 = scmp.eq.s32.totalorder %s1362_s28, 7 }
 0x19d   : > { %p1219_p12 = scmp.ne.s32.totalorder %s1566_s18, %s1218_s23  ;;  %p1225_p13 = scmp.lt.s32.totalorder %s1566_s18, %s1566_s18 }
 0x19e   : > { %p1226_p5 = scmp.lt.s32.totalorder %s1218_s23, %s1218_s23 }
 0x19f   : > { %p1220_p7 = pnand %p1219_p12, %p1658_p3 }
 0x1a0   : > { %p1227_p8 = por %p1226_p5, %p1225_p13 }
 0x1a1   : > { %p1221_p10 = pneg %p1220_p7 }
 0x1a3   : > { %p1228_p0 = pnand %p1227_p8, %p1221_p10 }
 0x1a5   : > { %1231 = shalt.err (!%p1228_p0)
}
 0x1a6   : > { %s1232_s20 = scalar_lea.hbm %s1642_s7, 32  ;;  %p1659_p11 = pmov %p1658_p3 }
 0x1a7   : > { %p1233_p4 = scmp.ne.s32.totalorder %s1642_s7, %s1232_s20  ;;  %p1238_p6 = scmp.lt.u32.totalorder %s1232_s20, %s1642_s7 }
 0x1a9   : > { %p1234_p1 = pnand %p1233_p4, %p1659_p11 }
 0x1ab   : > { %p1235_p2 = pneg %p1234_p1 }
 0x1ad   : > { %p1240_p9 = pnand %p1238_p6, %p1235_p2 }
 0x1af   : > { %1243 = shalt.err (!%p1240_p9)
}
 0x1b0   : > { %p1660_p12 = pmov %p1658_p3 }
 0x1b2   : > { %1016 = dma.vmem_to_hbm [thread:$0]  (%p1660_p12), %s1566_s18, 32, %s1642_s7, [#allocation11]  }
 0x1b3   : > { %1269 = dma.done.wait (%p1658_p3), [#allocation11], 32   ;;  %p1661_p7 = pmov %p1658_p3 }
 0x1b5   : > { %1271 = vsyncadd (%p1661_p7), [#allocation11], 4294967264 }
 0x1b6 PF: > { %p1042_p10 = scmp.ge.s32.totalorder %s1290_s27, 2  ;;  %s793_s30 = sand.u32 1, %s1278_s24  }
 0x1b7   : > { %p1662_p13 = scmp.ne.s32.totalorder %s1647_s8, 0  ;;  %s794_s10 = scalar_lea.sflag [#allocation5], %s793_s30 }
 0x1b9   : > { %p1032_p5 = pnand %p1042_p10, %p1662_p13 }
 0x1bb   : > { %1273 = dma.done.wait (!%p1032_p5), %s794_s10, 32  }
 0x1bc   : > { %1275 = vsyncadd (!%p1032_p5), %s794_s10, 4294967264  ;;  %p23_p8 = scmp.ge.s32.totalorder %s1444_s13, 10   ;;  %s1663_s24 = smov %s1282_s25 }
 0x1bd   : > { %s1664_s25 = smov %s1286_s26  ;;  %s1665_s26 = smov %s1460_s17 }
 0x1be   : > { %s1666_s27 = smov %s1444_s13  ;;  %25 = sbr.rel (!%p23_p8) target bundleno = 7 (0x7), region = 117 }
 0x1c5   :  { %799 = vsyncpa [#allocation4], 1 }
 0x1c6   :  { %801 = vsyncpa [#allocation4 + $0x1], 1 }
 0x1c7   :  { %802 = vsyncpa [#allocation7], 1 }
 0x1c8   :  { %803 = vsyncpa [#allocation5], 1 }
 0x1c9   :  { %805 = vsyncpa [#allocation5 + $0x1], 1 }
 0x1ca   :  { %806 = vsyncpa [#allocation11], 1 }

</bundles_post_ra>
